<compile_context>
chip_gen: v7x
topology: tpu7x:2x2x1
jax: 0.10.0
libtpu: 0.0.40
codegen_flags: <defaults>
</compile_context>

<pallas_src>
import functools

import jax
import jax.numpy as jnp
from jax.experimental import pallas as pl
from jax.experimental.pallas import tpu as pltpu


def _round_up(x, m):
    return ((x + m - 1) // m) * m


def _dual_mlp_kernel(x_ref, w1_ref, b1_ref, w2_ref, b2_ref, wh_ref, bh_ref,
                     attack_ref, severity_ref, *, na, ns):
    # In-kernel f32 -> bf16 cast of the x tile (saves a separate HBM convert pass).
    x = x_ref[...].astype(jnp.bfloat16)                          # (TB, F)

    # fc1 + ReLU.  Dropout(0.3) is the eval-mode identity.
    # TODO(synk): training-mode dropout (pltpu.prng_seed / prng_random_bits mask
    # + 1/(1-p) scale) is not emitted.
    h1 = jnp.dot(x, w1_ref[...], preferred_element_type=jnp.float32) + b1_ref[...]
    h1 = jnp.maximum(h1, 0.0)

    # fc2 + ReLU
    h2 = jnp.dot(h1.astype(jnp.bfloat16), w2_ref[...],
                 preferred_element_type=jnp.float32) + b2_ref[...]
    h2 = jnp.maximum(h2, 0.0)

    # Fused (attack | severity) head: one MXU push, then split in-register and
    # store two narrow, un-padded logits tiles (no 128-lane zero padding, no
    # wrapper-side slices).
    y = jnp.dot(h2.astype(jnp.bfloat16), wh_ref[...],
                preferred_element_type=jnp.float32) + bh_ref[...]
    attack_ref[...] = y[:, :na].astype(attack_ref.dtype)
    severity_ref[...] = y[:, na:na + ns].astype(severity_ref.dtype)


def prepare_params(params):
    """One-time parameter prep (call once, NOT per forward step):
    fuse the two heads and cast MXU operands to bf16."""
    wh = jnp.concatenate([params["wa"], params["ws"]], axis=1).astype(jnp.bfloat16)
    bh = jnp.concatenate([params["ba"], params["bs"]], axis=1).astype(jnp.float32)
    return {
        "w1": params["w1"].astype(jnp.bfloat16),
        "b1": params["b1"].astype(jnp.float32),
        "w2": params["w2"].astype(jnp.bfloat16),
        "b2": params["b2"].astype(jnp.float32),
        "wh": wh,
        "bh": bh,
        "na": int(params["wa"].shape[1]),
        "ns": int(params["ws"].shape[1]),
    }


def dual_output_nn_forward(x, prep, *, block_rows=512):
    """x: (B, input_size) float32.  prep: output of prepare_params.

    Returns (attack_logits (B, na), severity_logits (B, ns)) in float32.
    """
    B, F = x.shape
    H = prep["w1"].shape[1]
    H2 = prep["w2"].shape[1]
    na, ns = prep["na"], prep["ns"]
    n_out = na + ns

    # ---- batch tiling --------------------------------------------------------
    #  * balanced tiles when B > block_rows (caps padding waste to the tile
    #    remainder instead of padding B up to a fixed 512 multiple),
    #  * >= 2 tiles whenever B > 8 so ("parallel",) can shard the batch across
    #    the two TensorCores on v7x,
    #  * TB is a multiple of 8 (sublane); block_rows default 512 keeps large,
    #    evenly-divisible batches on 256-multiples for the v6e/v7x MXU.
    if B <= 8:
        n_tiles = 1
    else:
        n_tiles = max(2, pl.cdiv(B, block_rows))
    TB = _round_up(pl.cdiv(B, n_tiles), 8)
    B_pad = _round_up(B, TB)
    grid_steps = B_pad // TB
    if B_pad != B:
        x = jnp.pad(x, ((0, B_pad - B), (0, 0)))   # small balanced-tile remainder only

    batched = lambda i: (i, 0)     # x / logits tiles walk the batch axis
    resident = lambda i: (0, 0)    # weights & biases stay VMEM-resident

    # Deeper buffering hides DMA latency behind the tiny per-tile compute; only
    # meaningful with at least 3 grid steps.
    _buffered = getattr(pl, "Buffered", None)

    def _batched_spec(shape):
        if grid_steps >= 3 and _buffered is not None:
            return pl.BlockSpec(shape, batched, pipeline_mode=_buffered(3))
        return pl.BlockSpec(shape, batched)

    flops = 2 * B_pad * (F * H + H * H2 + H2 * n_out)
    bytes_accessed = (
        B_pad * F * 4                                  # x (f32, cast in-kernel)
        + (F * H + H * H2 + H2 * n_out) * 2            # weights (bf16)
        + (H + H2 + n_out) * 4                         # biases (f32)
        + B_pad * n_out * 4                            # un-padded logits (f32)
    )

    attack, severity = pl.pallas_call(
        functools.partial(_dual_mlp_kernel, na=na, ns=ns),
        out_shape=(jax.ShapeDtypeStruct((B_pad, na), jnp.float32),
                   jax.ShapeDtypeStruct((B_pad, ns), jnp.float32)),
        grid=(grid_steps,),
        in_specs=[
            _batched_spec((TB, F)),                    # x tile (pipelined)
            pl.BlockSpec((F, H), resident),            # w1
            pl.BlockSpec((1, H), resident),            # b1
            pl.BlockSpec((H, H2), resident),           # w2
            pl.BlockSpec((1, H2), resident),           # b2
            pl.BlockSpec((H2, n_out), resident),       # fused head weight (no 128 pad)
            pl.BlockSpec((1, n_out), resident),        # fused head bias
        ],
        out_specs=[_batched_spec((TB, na)),            # attack logits
                   _batched_spec((TB, ns))],           # severity logits
        compiler_params=pltpu.CompilerParams(
            dimension_semantics=("parallel",)),
        cost_estimate=pl.CostEstimate(
            flops=flops, transcendentals=0, bytes_accessed=bytes_accessed),
    )(x, prep["w1"], prep["b1"], prep["w2"], prep["b2"], prep["wh"], prep["bh"])

    if B_pad != B:
        attack, severity = attack[:B], severity[:B]
    return attack, severity


def init_params(key, input_size, hidden_size, num_classes_attack, num_classes_severity):
    """PyTorch nn.Linear default init: U[-1/sqrt(fan_in), 1/sqrt(fan_in)].
    Weights stored as (in, out) — transposed vs. PyTorch's (out, in)."""
    h2 = hidden_size // 2
    layers = [
        ("w1", "b1", input_size, hidden_size),
        ("w2", "b2", hidden_size, h2),
        ("wa", "ba", h2, num_classes_attack),
        ("ws", "bs", h2, num_classes_severity),
    ]
    params = {}
    keys = jax.random.split(key, 2 * len(layers))
    for idx, (wn, bn, fan_in, fan_out) in enumerate(layers):
        bound = 1.0 / (fan_in ** 0.5)
        params[wn] = jax.random.uniform(keys[2 * idx], (fan_in, fan_out),
                                        jnp.float32, -bound, bound)
        params[bn] = jax.random.uniform(keys[2 * idx + 1], (1, fan_out),
                                        jnp.float32, -bound, bound)
    return params


def _reference(x, p):
    """Plain-JAX reference mirroring the kernel's bf16-operand / f32-accumulate matmuls."""
    def mm(a, w):
        return jnp.dot(a.astype(jnp.bfloat16), w.astype(jnp.bfloat16),
                       preferred_element_type=jnp.float32)
    h1 = jnp.maximum(mm(x, p["w1"]) + p["b1"], 0.0)
    h2 = jnp.maximum(mm(h1, p["w2"]) + p["b2"], 0.0)
    return mm(h2, p["wa"]) + p["ba"], mm(h2, p["ws"]) + p["bs"]


if __name__ == "__main__":
    # Small shapes consistent with the module's forward.
    batch = 8
    input_size = 32
    hidden_size = 32           # hidden_size // 2 = 16
    num_classes_attack = 5
    num_classes_severity = 3

    key = jax.random.PRNGKey(0)
    kx, kp, kx2 = jax.random.split(key, 3)
    x = jax.random.normal(kx, (batch, input_size), jnp.float32)
    params = init_params(kp, input_size, hidden_size,
                         num_classes_attack, num_classes_severity)
    prep = prepare_params(params)     # one-time prep, hoisted out of the forward

    attack_out, severity_out = dual_output_nn_forward(x, prep)
    jax.block_until_ready((attack_out, severity_out))

    ref_a, ref_s = _reference(x, params)
    assert attack_out.shape == (batch, num_classes_attack)
    assert severity_out.shape == (batch, num_classes_severity)
    assert jnp.allclose(attack_out, ref_a, atol=2e-3, rtol=2e-3)
    assert jnp.allclose(severity_out, ref_s, atol=2e-3, rtol=2e-3)

    # Second call exercising the multi-tile grid (megacore sharding on v7x),
    # ragged-batch padding and the 3-deep buffered pipeline.
    b2 = 300
    x2 = jax.random.normal(kx2, (b2, input_size), jnp.float32)
    a2, s2 = dual_output_nn_forward(x2, prep, block_rows=64)
    jax.block_until_ready((a2, s2))
    r2a, r2s = _reference(x2, params)
    assert a2.shape == (b2, num_classes_attack)
    assert s2.shape == (b2, num_classes_severity)
    assert jnp.allclose(a2, r2a, atol=2e-3, rtol=2e-3)
    assert jnp.allclose(s2, r2s, atol=2e-3, rtol=2e-3)

    print("KERNEL_OK")
</pallas_src>

<mosaic_0001>
module attributes {stable_mosaic.version = 11 : i64} {
  func.func @_dual_mlp_kernel(%arg0: i32, %arg1: memref<8x32xf32, #tpu.memory_space<vmem>>, %arg2: memref<32x32xbf16, #tpu.memory_space<vmem>>, %arg3: memref<1x32xf32, #tpu.memory_space<vmem>>, %arg4: memref<32x16xbf16, #tpu.memory_space<vmem>>, %arg5: memref<1x16xf32, #tpu.memory_space<vmem>>, %arg6: memref<16x8xbf16, #tpu.memory_space<vmem>>, %arg7: memref<1x8xf32, #tpu.memory_space<vmem>>, %arg8: memref<8x5xf32, #tpu.memory_space<vmem>>, %arg9: memref<8x3xf32, #tpu.memory_space<vmem>>) attributes {dimension_semantics = [#tpu.dimension_semantics<parallel>], iteration_bounds = array<i64: 1>, scalar_prefetch = 0 : i64, scratch_operands = 0 : i64, tpu.core_type = #tpu.core_type<tc>, window_params = [{transform_indices = @transform_0, window_bounds = array<i64: 8, 32>}, {pipeline_mode = #tpu.pipeline_mode<synchronous>, transform_indices = @transform_1, window_bounds = array<i64: 32, 32>}, {pipeline_mode = #tpu.pipeline_mode<synchronous>, transform_indices = @transform_2, window_bounds = array<i64: 1, 32>}, {pipeline_mode = #tpu.pipeline_mode<synchronous>, transform_indices = @transform_3, window_bounds = array<i64: 32, 16>}, {pipeline_mode = #tpu.pipeline_mode<synchronous>, transform_indices = @transform_4, window_bounds = array<i64: 1, 16>}, {pipeline_mode = #tpu.pipeline_mode<synchronous>, transform_indices = @transform_5, window_bounds = array<i64: 16, 8>}, {pipeline_mode = #tpu.pipeline_mode<synchronous>, transform_indices = @transform_6, window_bounds = array<i64: 1, 8>}, {transform_indices = @transform_7, window_bounds = array<i64: 8, 5>}, {transform_indices = @transform_8, window_bounds = array<i64: 8, 3>}]} {
    %c0 = arith.constant 0 : index
    %c0_0 = arith.constant 0 : index
    %0 = vector.load %arg1[%c0, %c0_0] : memref<8x32xf32, #tpu.memory_space<vmem>>, vector<8x32xf32>
    %1 = arith.truncf %0 : vector<8x32xf32> to vector<8x32xbf16>
    %c0_1 = arith.constant 0 : index
    %c0_2 = arith.constant 0 : index
    %2 = vector.load %arg2[%c0_1, %c0_2] : memref<32x32xbf16, #tpu.memory_space<vmem>>, vector<32x32xbf16>
    %cst = arith.constant dense<0.000000e+00> : vector<8x32xf32>
    %3 = tpu.matmul %1, %2, %cst {dimension_numbers = #tpu.dot_dimension_numbers<[1], [0], [0], [1], [0, 0, 1, 1], [], []>} : vector<8x32xbf16>, vector<32x32xbf16>, vector<8x32xf32> -> vector<8x32xf32>
    %c0_3 = arith.constant 0 : index
    %c0_4 = arith.constant 0 : index
    %4 = vector.load %arg3[%c0_3, %c0_4] : memref<1x32xf32, #tpu.memory_space<vmem>>, vector<1x32xf32>
    %5 = vector.broadcast %4 : vector<1x32xf32> to vector<8x32xf32>
    %6 = arith.addf %3, %5 : vector<8x32xf32>
    %cst_5 = arith.constant 0.000000e+00 : f32
    %7 = vector.broadcast %cst_5 : f32 to vector<8x32xf32>
    %8 = arith.maximumf %6, %7 : vector<8x32xf32>
    %9 = arith.truncf %8 : vector<8x32xf32> to vector<8x32xbf16>
    %c0_6 = arith.constant 0 : index
    %c0_7 = arith.constant 0 : index
    %10 = vector.load %arg4[%c0_6, %c0_7] : memref<32x16xbf16, #tpu.memory_space<vmem>>, vector<32x16xbf16>
    %cst_8 = arith.constant dense<0.000000e+00> : vector<8x16xf32>
    %11 = tpu.matmul %9, %10, %cst_8 {dimension_numbers = #tpu.dot_dimension_numbers<[1], [0], [0], [1], [0, 0, 1, 1], [], []>} : vector<8x32xbf16>, vector<32x16xbf16>, vector<8x16xf32> -> vector<8x16xf32>
    %c0_9 = arith.constant 0 : index
    %c0_10 = arith.constant 0 : index
    %12 = vector.load %arg5[%c0_9, %c0_10] : memref<1x16xf32, #tpu.memory_space<vmem>>, vector<1x16xf32>
    %13 = vector.broadcast %12 : vector<1x16xf32> to vector<8x16xf32>
    %14 = arith.addf %11, %13 : vector<8x16xf32>
    %cst_11 = arith.constant 0.000000e+00 : f32
    %15 = vector.broadcast %cst_11 : f32 to vector<8x16xf32>
    %16 = arith.maximumf %14, %15 : vector<8x16xf32>
    %17 = arith.truncf %16 : vector<8x16xf32> to vector<8x16xbf16>
    %c0_12 = arith.constant 0 : index
    %c0_13 = arith.constant 0 : index
    %18 = vector.load %arg6[%c0_12, %c0_13] : memref<16x8xbf16, #tpu.memory_space<vmem>>, vector<16x8xbf16>
    %cst_14 = arith.constant dense<0.000000e+00> : vector<8x8xf32>
    %19 = tpu.matmul %17, %18, %cst_14 {dimension_numbers = #tpu.dot_dimension_numbers<[1], [0], [0], [1], [0, 0, 1, 1], [], []>} : vector<8x16xbf16>, vector<16x8xbf16>, vector<8x8xf32> -> vector<8x8xf32>
    %c0_15 = arith.constant 0 : index
    %c0_16 = arith.constant 0 : index
    %20 = vector.load %arg7[%c0_15, %c0_16] : memref<1x8xf32, #tpu.memory_space<vmem>>, vector<1x8xf32>
    %21 = vector.broadcast %20 : vector<1x8xf32> to vector<8x8xf32>
    %22 = arith.addf %19, %21 : vector<8x8xf32>
    %23 = vector.extract_strided_slice %22 {offsets = [0, 0], sizes = [8, 5], strides = [1, 1]} : vector<8x8xf32> to vector<8x5xf32>
    %c0_17 = arith.constant 0 : index
    %c0_18 = arith.constant 0 : index
    %24 = vector.load %arg8[%c0_17, %c0_18] : memref<8x5xf32, #tpu.memory_space<vmem>>, vector<8x5xf32>
    tpu.vector_store %arg8[%c0_17, %c0_18], %23 {strides = array<i32>} : memref<8x5xf32, #tpu.memory_space<vmem>>, vector<8x5xf32>,
    %25 = vector.extract_strided_slice %22 {offsets = [0, 5], sizes = [8, 3], strides = [1, 1]} : vector<8x8xf32> to vector<8x3xf32>
    %c0_19 = arith.constant 0 : index
    %c0_20 = arith.constant 0 : index
    %26 = vector.load %arg9[%c0_19, %c0_20] : memref<8x3xf32, #tpu.memory_space<vmem>>, vector<8x3xf32>
    tpu.vector_store %arg9[%c0_19, %c0_20], %25 {strides = array<i32>} : memref<8x3xf32, #tpu.memory_space<vmem>>, vector<8x3xf32>,
    return
  }
  func.func @transform_0(%arg0: i32) -> (i32, i32) {
    %c0_i32 = arith.constant 0 : i32
    %c0_i32_0 = arith.constant 0 : i32
    return %arg0, %c0_i32 : i32, i32
  }
  func.func @transform_1(%arg0: i32) -> (i32, i32) {
    %c0_i32 = arith.constant 0 : i32
    %c0_i32_0 = arith.constant 0 : i32
    %c0_i32_1 = arith.constant 0 : i32
    return %c0_i32, %c0_i32_0 : i32, i32
  }
  func.func @transform_2(%arg0: i32) -> (i32, i32) {
    %c0_i32 = arith.constant 0 : i32
    %c0_i32_0 = arith.constant 0 : i32
    %c0_i32_1 = arith.constant 0 : i32
    return %c0_i32, %c0_i32_0 : i32, i32
  }
  func.func @transform_3(%arg0: i32) -> (i32, i32) {
    %c0_i32 = arith.constant 0 : i32
    %c0_i32_0 = arith.constant 0 : i32
    %c0_i32_1 = arith.constant 0 : i32
    return %c0_i32, %c0_i32_0 : i32, i32
  }
  func.func @transform_4(%arg0: i32) -> (i32, i32) {
    %c0_i32 = arith.constant 0 : i32
    %c0_i32_0 = arith.constant 0 : i32
    %c0_i32_1 = arith.constant 0 : i32
    return %c0_i32, %c0_i32_0 : i32, i32
  }
  func.func @transform_5(%arg0: i32) -> (i32, i32) {
    %c0_i32 = arith.constant 0 : i32
    %c0_i32_0 = arith.constant 0 : i32
    %c0_i32_1 = arith.constant 0 : i32
    return %c0_i32, %c0_i32_0 : i32, i32
  }
  func.func @transform_6(%arg0: i32) -> (i32, i32) {
    %c0_i32 = arith.constant 0 : i32
    %c0_i32_0 = arith.constant 0 : i32
    %c0_i32_1 = arith.constant 0 : i32
    return %c0_i32, %c0_i32_0 : i32, i32
  }
  func.func @transform_7(%arg0: i32) -> (i32, i32) {
    %c0_i32 = arith.constant 0 : i32
    %c0_i32_0 = arith.constant 0 : i32
    return %arg0, %c0_i32 : i32, i32
  }
  func.func @transform_8(%arg0: i32) -> (i32, i32) {
    %c0_i32 = arith.constant 0 : i32
    %c0_i32_0 = arith.constant 0 : i32
    return %arg0, %c0_i32 : i32, i32
  }
}

</mosaic_0001>

<bundles_post_ra>
// kernel: tpu_custom_call.1
= control target key start
LH: loop header
LB: loop body
LE: loop exit
PB: predicated region body
PF: predicated region fallthrough
CT: control target
= control target key end

     0   :  { %v328_v1 = vmov 0.0   ;;  %vm329_vm0 = vmmov 0   ;;  %s421_s0 = inlined_call_operand.vmem [shape: f32[8,32], index: 0, kind: input, shape index: {}]   ;;  %s422_s1 = inlined_call_operand.vmem [shape: bf16[32,32], index: 1, kind: input, shape index: {}]   ;;  %s423_s2 = inlined_call_operand.vmem [shape: f32[1,32], index: 2, kind: input, shape index: {}]   ;;  %s424_s3 = inlined_call_operand.vmem [shape: bf16[32,16], index: 3, kind: input, shape index: {}]   ;;  %s425_s4 = inlined_call_operand.vmem [shape: f32[1,16], index: 4, kind: input, shape index: {}]   ;;  %s426_s5 = inlined_call_operand.vmem [shape: bf16[16,8], index: 5, kind: input, shape index: {}]   ;;  %s427_s6 = inlined_call_operand.vmem [shape: f32[1,8], index: 6, kind: input, shape index: {}]   ;;  %s428_s7 = inlined_call_operand.hbm [shape: f32[8,5], index: 7, kind: output, shape index: {0}]   ;;  %s429_s8 = inlined_call_operand.vmem [shape: f32[8,3], index: 8, kind: output, shape index: {1}]  }
   0x1   :  { %v299_v0 = vld [vmem:[%s422_s1] sm:$0xff]   ;;  %273 = vmatprep.subr.bf16.mxu0 %v328_v1  ;;  %281 = vmatprep.subr.bf16.mxu1 %v328_v1  ;;  %v300_v2 = vld [vmem:[%s422_s1 + $0x8] sm:$0xff]  }
   0x2   :  { %274 = vmatpush3.bf16.msra.mxu0 %v299_v0  ;;  %277 = vmatprep.mubr.msk.bf16.mxu0 %vm329_vm0, %v328_v1  ;;  %v30_v3 = vld [vmem:[%s421_s0] sm:$0xff] }
   0x3   :  { %275 = vmatprep.subr.bf16.mxu0 %v328_v1  ;;  %285 = vmatprep.mubr.msk.bf16.mxu1 %vm329_vm0, %v328_v1 }
   0x4   :  { %14 = vsyncpa [#allocation3], 0  ;;  %v31_v4 = vpack.c.bf16 %v30_v3, %v30_v3  ;;  %vm55_vm1 = vcmask 261120   ;;  %v301_v5 = vld [vmem:[%s424_s3] sm:$0xff]   ;;  %v302_v6 = vld [vmem:[%s424_s3 + $0x8] sm:$0xff]   ;;  %vm184_vm2 = vcmask 130048  }
   0x5   :  { %282 = vmatpush3.bf16.msra.mxu1 %v301_v5  ;;  %v303_v7 = vld [vmem:[%s426_s5] sm:$0xff]   ;;  %s330_s18 = smov [#allocation2]   ;;  %vm228_vm3 = vcmask 39936  }
   0x6   :  { %276 = vmatpush3.bf16.msra.mxu0 %v300_v2  ;;  %283 = vmatprep.subr.bf16.mxu1 %v328_v1  ;;  %v254_v8 = vld [vmem:[%s423_s2] ss:$0 sm:$0xff]  ;;  %s242_s19 = sshll.u32 %s330_s18, 4  ;;  %s243_s19 = int_to_ptr.vmem [resolvable:$true] %s242_s19 }
   0x7   :  { %289 = vmatprep.subr.bf16.mxu0 %v328_v1  ;;  %v258_v16 = vld [vmem:[%s425_s4] ss:$0 sm:$0xff]  ;;  %s331_s4 = smov 123   ;;  %s304_s20 = scalar_lea.vmem %s243_s19, 128 }
   0x8   :  { %v262_v24 = vld [vmem:[%s427_s6] ss:$0 sm:$0xff]  ;;  %p305_p0 = scmp.ne.s32.totalorder %s243_s19, %s304_s20  ;;  %p309_p1 = scmp.lt.s32.totalorder %s243_s19, %s243_s19 }
   0x9   :  { %278 = vmatmul.mubr.msk.bf16.vlgmr.msra.gmra.mrb[0].mxu0 %vm55_vm1, %v31_v4  ;;  %284 = vmatpush3.bf16.msra.mxu1 %v302_v6  ;;  %p310_p2 = scmp.lt.s32.totalorder %s304_s20, %s304_s20 }
   0xa   :  { %291 = vmatprep.mubr.msk.bf16.mxu0 %vm329_vm0, %v328_v1  ;;  %290 = vmatpush3.bf16.msra.mxu0 %v303_v7 }
   0xb   :  { %p311_p3 = por %p310_p2, %p309_p1 }
   0xd   :  { %p312_p4 = pnand %p311_p3, %p305_p0 }
  0xdc   :  { %v93_v9 = vpop.f32.mrb[0].mxu0 }
  0xdd   :  { %v94_v10 = vadd.f32 %v254_v8, %v93_v9  ;;  %v279_v11 = vpop.f32.mrb[1].mxu0 }
  0xde   :  { %v96_v12 = vpop.f32.mrb[2].mxu0 }
  0xdf   :  { %v99_v13 = vmax.f32 %v94_v10, 0.0  ;;  %v280_v14 = vpop.f32.mrb[3].mxu0 }
  0xe1   :  { %v100_v15 = vpack.c.bf16 %v99_v13, %v99_v13 }
  0xe3   :  { %286 = vmatmul.mubr.msk.bf16.vlgmr.msra.gmra.mrb[0].mxu1 %vm55_vm1, %v100_v15 }
 0x1b6   :  { %v161_v17 = vpop.f32.mrb[0].mxu1 }
 0x1b7   :  { %v162_v18 = vadd.f32 %v258_v16, %v161_v17  ;;  %v287_v19 = vpop.f32.mrb[1].mxu1 }
 0x1b8   :  { %v164_v20 = vpop.f32.mrb[2].mxu1 }
 0x1b9   :  { %v167_v21 = vmax.f32 %v162_v18, 0.0  ;;  %v288_v22 = vpop.f32.mrb[3].mxu1 }
 0x1bb   :  { %v168_v23 = vpack.c.bf16 %v167_v21, %v167_v21 }
 0x1bd   :  { %292 = vmatmul.mubr.msk.bf16.vlgmr.msra.gmra.mrb[4].mxu0 %vm184_vm2, %v168_v23 }
 0x290   :  { %v222_v25 = vpop.f32.mrb[4].mxu0 }
 0x291   :  { %v223_v26 = vadd.f32 %v262_v24, %v222_v25  ;;  %v293_v27 = vpop.f32.mrb[5].mxu0 }
 0x292   :  { %v225_v28 = vpop.f32.mrb[6].mxu0 }
 0x293   :  { %v294_v29 = vpop.f32.mrb[7].mxu0  ;;  %231 = vrot.lane.b32.xlu0 %v223_v26, %s331_s4  ;;  %229 = vst.msk [vmem:[#allocation2] sm:$0xff] %vm228_vm3, %v223_v26 }
 0x294   :  { %315 = shalt.err (!%p312_p4)
}
 0x295   :  { %s316_s22 = scalar_lea.hbm %s428_s7, 128 }
 0x296   :  { %p317_p5 = scmp.ne.s32.totalorder %s428_s7, %s316_s22  ;;  %p320_p6 = scmp.lt.u32.totalorder %s316_s22, %s428_s7 }
 0x298   :  { %p322_p7 = pnand %p320_p6, %p317_p5 }
 0x29a   :  { %325 = shalt.err (!%p322_p7)
}
 0x29b   :  { %245 = dma.vmem_to_hbm [thread:$0]  %s243_s19, 128, %s428_s7, [#allocation3]   ;;  %vm234_vm4 = vcmask 23552  }
 0x305   :  { %v232_v30 = vpop.permute.xlu0 %231 }
 0x306   :  { %235 = vst.msk [vmem:[%s429_s8] sm:$0xff] %vm234_vm4, %v232_v30 }
 0x307   :  { %326 = dma.done.wait [#allocation3], 128  }
 0x308   :  { %327 = vsyncadd [#allocation3], 4294967168 }
 0x309   :  { %253 = vsyncpa [#allocation3], 1 }

</bundles_post_ra>
